<compile_context>
chip_gen: v7x
topology: tpu7x:2x2x1
jax: 0.10.0
libtpu: 0.0.40
codegen_flags: <defaults>
</compile_context>

<pallas_src>
import functools

import jax
import jax.numpy as jnp
from jax.experimental import pallas as pl
from jax.experimental.pallas import tpu as pltpu


def _round_up(x, m):
    return (x + m - 1) // m * m


def _round_lanes(n):
    # <=128 -> one 128-lane tile; larger dims round to 256 so both matmuls map
    # onto full 2x256^2 MXU passes on v6e/v7x (v5e's 4x128 MXU is indifferent).
    return 128 if n <= 128 else _round_up(n, 256)


def _choose_tb(b, max_tb=512, min_steps=4):
    """Largest batch tile (multiple of 16) up to max_tb, while keeping at least
    min_steps grid steps for software pipelining when the batch is big enough."""
    if b <= max_tb:
        return _round_up(b, 16)
    return min(max_tb, _round_up(-(-b // min_steps), 16))


def pgd_forward_kernel(x_ref, eps_ref, w1_ref, b1_ref, w2_ref, b2_ref, out_ref):
    # x / epsilon arrive as bf16 (halves the dominant HBM stream); upcast to
    # f32 so add/clamp/bias/ReLU stay on the native VPU path (v5e has no bf16 VPU).
    x_adv = jnp.clip(
        x_ref[...].astype(jnp.float32) + eps_ref[...].astype(jnp.float32),
        0.0, 1.0)

    # hidden = relu(x_adv @ W1 + b1): bf16 at the MXU inputs, f32 accumulate.
    # Kept as a local value — produced and consumed in the same grid step, so
    # no VMEM scratch store/load round-trip.
    h = jnp.dot(x_adv.astype(jnp.bfloat16), w1_ref[...],
                preferred_element_type=jnp.float32)
    h = jnp.maximum(h + b1_ref[...], 0.0)

    # logits = hidden @ W2 + b2
    out_ref[...] = (
        jnp.dot(h.astype(jnp.bfloat16), w2_ref[...],
                preferred_element_type=jnp.float32)
        + b2_ref[...]
    )


@functools.partial(jax.jit, static_argnames=("tb",))
def pgd_adversary_forward(x_batch, epsilon, w1, b1, w2, b2, *, tb=None):
    B, D = x_batch.shape
    H = w1.shape[1]
    C = w2.shape[1]
    if tb is None:
        tb = _choose_tb(B)

    Hp, Cp = _round_lanes(H), _round_lanes(C)

    # Streamed per-step traffic: bf16, completely un-padded.  The last block
    # dim may equal the full array dim (D), and a ragged last batch tile is
    # masked by the grid, so the streamed HBM bytes are exactly 2 * B * D * 2.
    x_s = x_batch.astype(jnp.bfloat16)
    e_s = epsilon.astype(jnp.bfloat16)

    # Resident parameters (constant index_map -> DMA'd once, live in VMEM):
    # bf16 weights for the MXU, f32 biases.  Only the *output* feature axes
    # (Hp, Cp) are lane-padded; W1's row axis stays D.
    w1_p = jnp.pad(w1.astype(jnp.bfloat16), ((0, 0), (0, Hp - H)))
    b1_p = jnp.pad(b1.reshape(1, -1).astype(jnp.float32), ((0, 0), (0, Hp - H)))
    w2_p = jnp.pad(w2.astype(jnp.bfloat16), ((0, Hp - H), (0, Cp - C)))
    b2_p = jnp.pad(b2.reshape(1, -1).astype(jnp.float32), ((0, 0), (0, Cp - C)))

    grid = (pl.cdiv(B, tb),)

    cost = pl.CostEstimate(
        flops=2 * B * D * Hp + 2 * B * Hp * Cp,
        transcendentals=0,
        bytes_accessed=((x_s.size + e_s.size) * 2
                        + (w1_p.size + w2_p.size) * 2
                        + (b1_p.size + b2_p.size) * 4
                        + B * Cp * 4),
    )

    # Explicit VMEM budget: double-buffered streams/output + resident params
    # (default-double-buffered) + headroom for the matmul temporaries.
    vmem_need = (
        2 * 2 * (tb * D * 2)                              # x, eps (bf16, 2 bufs)
        + 2 * (tb * Cp * 4)                               # out tile (f32, 2 bufs)
        + 2 * ((D * Hp + Hp * Cp) * 2 + (Hp + Cp) * 4)    # W1/W2/b1/b2 (2 bufs)
        + tb * Hp * 4 + tb * Cp * 4                       # x_adv / h temporaries
    )
    vmem_limit = int(min(max(2 * vmem_need, 16 << 20), 60 << 20))

    out = pl.pallas_call(
        pgd_forward_kernel,
        out_shape=jax.ShapeDtypeStruct((B, Cp), jnp.float32),
        grid_spec=pltpu.PrefetchScalarGridSpec(
            num_scalar_prefetch=0,
            grid=grid,
            in_specs=[
                pl.BlockSpec((tb, D), lambda i: (i, 0)),    # x     (streamed bf16)
                pl.BlockSpec((tb, D), lambda i: (i, 0)),    # eps   (streamed bf16)
                # TODO(synk): on v7x with large H/D, single-buffer the four
                # resident params via pipeline_mode=pl.Buffered(1) to halve
                # their VMEM footprint (constant index_map -> no benefit from
                # double buffering).
                pl.BlockSpec((D, Hp), lambda i: (0, 0)),    # W1 (resident)
                pl.BlockSpec((1, Hp), lambda i: (0, 0)),    # b1 (resident)
                pl.BlockSpec((Hp, Cp), lambda i: (0, 0)),   # W2 (resident)
                pl.BlockSpec((1, Cp), lambda i: (0, 0)),    # b2 (resident)
            ],
            out_specs=pl.BlockSpec((tb, Cp), lambda i: (i, 0)),
        ),
        compiler_params=pltpu.CompilerParams(
            dimension_semantics=("parallel",),   # batch tiles -> both TCs on v7x
            vmem_limit_bytes=vmem_limit,
        ),
        cost_estimate=cost,
    )(x_s, e_s, w1_p, b1_p, w2_p, b2_p)

    # Strip class-lane padding (no batch padding was added).
    return out[:, :C]


def init_epsilon(key, x_batch, max_epsilon):
    """Mirror PGDAdversary.__init__ exactly as written in the reference:
    uniform(-eps, eps), then max with clamp(x,0,eps) and min with clamp(1-x,0,eps)."""
    B, D = x_batch.shape
    eps = jax.random.uniform(
        key, (B, D), dtype=jnp.float32, minval=-max_epsilon, maxval=max_epsilon
    )
    min_eps = jnp.clip(x_batch, 0.0, max_epsilon)        # torch.clamp(x, 0, eps_max)
    max_eps = jnp.clip(1.0 - x_batch, 0.0, max_epsilon)  # torch.clamp(1-x, 0, eps_max)
    # NOTE: the PyTorch module's lower bound is non-negative by construction;
    # reproduced verbatim (not changed to -clamp(x,0,eps_max)).
    eps = jnp.maximum(eps, min_eps)
    eps = jnp.minimum(eps, max_eps)
    return eps


if __name__ == "__main__":
    # Small, deterministic example consistent with the module: x_batch is (B, D).
    B, D, H, C = 256, 32, 64, 16
    max_epsilon = 0.1

    key = jax.random.PRNGKey(0)
    k_x, k_eps, k_w1, k_w2 = jax.random.split(key, 4)

    # Inputs in [0, 1] (image-like), as implied by clamp(x + eps, 0, 1).
    x_batch = jax.random.uniform(k_x, (B, D), dtype=jnp.float32)
    epsilon = init_epsilon(k_eps, x_batch, max_epsilon)

    # Deterministic synthetic "model under attack" (2-layer MLP).
    w1 = jax.random.normal(k_w1, (D, H), dtype=jnp.float32) * 0.05
    b1 = jnp.zeros((1, H), dtype=jnp.float32)
    w2 = jax.random.normal(k_w2, (H, C), dtype=jnp.float32) * 0.05
    b2 = jnp.zeros((1, C), dtype=jnp.float32)

    logits = pgd_adversary_forward(x_batch, epsilon, w1, b1, w2, b2)
    jax.block_until_ready(logits)

    # Reference check in plain f32; kernel streams x/eps in bf16 and feeds the
    # MXU bf16 (f32 accumulate), so allow a correspondingly small tolerance.
    x_adv = jnp.clip(x_batch + epsilon, 0.0, 1.0)
    ref = jnp.maximum(x_adv @ w1 + b1, 0.0) @ w2 + b2
    assert logits.shape == (B, C)
    assert jnp.allclose(logits, ref, atol=1e-2, rtol=5e-2), (
        float(jnp.max(jnp.abs(logits - ref)))
    )

    print("KERNEL_OK")
</pallas_src>

<mosaic_0001>
module attributes {stable_mosaic.version = 11 : i64} {
  func.func @pgd_forward_kernel(%arg0: i32, %arg1: memref<256x32xbf16, #tpu.memory_space<vmem>>, %arg2: memref<256x32xbf16, #tpu.memory_space<vmem>>, %arg3: memref<32x128xbf16, #tpu.memory_space<vmem>>, %arg4: memref<1x128xf32, #tpu.memory_space<vmem>>, %arg5: memref<128x128xbf16, #tpu.memory_space<vmem>>, %arg6: memref<1x128xf32, #tpu.memory_space<vmem>>, %arg7: memref<256x128xf32, #tpu.memory_space<vmem>>) attributes {dimension_semantics = [#tpu.dimension_semantics<parallel>], iteration_bounds = array<i64: 1>, scalar_prefetch = 0 : i64, scratch_operands = 0 : i64, tpu.core_type = #tpu.core_type<tc>, window_params = [{transform_indices = @transform_0, window_bounds = array<i64: 256, 32>}, {transform_indices = @transform_1, window_bounds = array<i64: 256, 32>}, {pipeline_mode = #tpu.pipeline_mode<synchronous>, transform_indices = @transform_2, window_bounds = array<i64: 32, 128>}, {pipeline_mode = #tpu.pipeline_mode<synchronous>, transform_indices = @transform_3, window_bounds = array<i64: 1, 128>}, {pipeline_mode = #tpu.pipeline_mode<synchronous>, transform_indices = @transform_4, window_bounds = array<i64: 128, 128>}, {pipeline_mode = #tpu.pipeline_mode<synchronous>, transform_indices = @transform_5, window_bounds = array<i64: 1, 128>}, {transform_indices = @transform_6, window_bounds = array<i64: 256, 128>}]} {
    %c0 = arith.constant 0 : index
    %c0_0 = arith.constant 0 : index
    %0 = vector.load %arg1[%c0, %c0_0] : memref<256x32xbf16, #tpu.memory_space<vmem>>, vector<256x32xbf16>
    %1 = arith.extf %0 : vector<256x32xbf16> to vector<256x32xf32>
    %c0_1 = arith.constant 0 : index
    %c0_2 = arith.constant 0 : index
    %2 = vector.load %arg2[%c0_1, %c0_2] : memref<256x32xbf16, #tpu.memory_space<vmem>>, vector<256x32xbf16>
    %3 = arith.extf %2 : vector<256x32xbf16> to vector<256x32xf32>
    %4 = arith.addf %1, %3 : vector<256x32xf32>
    %cst = arith.constant 0.000000e+00 : f32
    %cst_3 = arith.constant 1.000000e+00 : f32
    %5 = vector.broadcast %cst : f32 to vector<256x32xf32>
    %6 = arith.maximumf %5, %4 : vector<256x32xf32>
    %7 = vector.broadcast %cst_3 : f32 to vector<256x32xf32>
    %8 = arith.minimumf %7, %6 : vector<256x32xf32>
    %9 = arith.truncf %8 : vector<256x32xf32> to vector<256x32xbf16>
    %c0_4 = arith.constant 0 : index
    %c0_5 = arith.constant 0 : index
    %10 = vector.load %arg3[%c0_4, %c0_5] : memref<32x128xbf16, #tpu.memory_space<vmem>>, vector<32x128xbf16>
    %cst_6 = arith.constant dense<0.000000e+00> : vector<256x128xf32>
    %11 = tpu.matmul %9, %10, %cst_6 {dimension_numbers = #tpu.dot_dimension_numbers<[1], [0], [0], [1], [0, 0, 1, 1], [], []>} : vector<256x32xbf16>, vector<32x128xbf16>, vector<256x128xf32> -> vector<256x128xf32>
    %c0_7 = arith.constant 0 : index
    %c0_8 = arith.constant 0 : index
    %12 = vector.load %arg4[%c0_7, %c0_8] : memref<1x128xf32, #tpu.memory_space<vmem>>, vector<1x128xf32>
    %13 = vector.broadcast %12 : vector<1x128xf32> to vector<256x128xf32>
    %14 = arith.addf %11, %13 : vector<256x128xf32>
    %cst_9 = arith.constant 0.000000e+00 : f32
    %15 = vector.broadcast %cst_9 : f32 to vector<256x128xf32>
    %16 = arith.maximumf %14, %15 : vector<256x128xf32>
    %17 = arith.truncf %16 : vector<256x128xf32> to vector<256x128xbf16>
    %c0_10 = arith.constant 0 : index
    %c0_11 = arith.constant 0 : index
    %18 = vector.load %arg5[%c0_10, %c0_11] : memref<128x128xbf16, #tpu.memory_space<vmem>>, vector<128x128xbf16>
    %cst_12 = arith.constant dense<0.000000e+00> : vector<256x128xf32>
    %19 = tpu.matmul %17, %18, %cst_12 {dimension_numbers = #tpu.dot_dimension_numbers<[1], [0], [0], [1], [0, 0, 1, 1], [], []>} : vector<256x128xbf16>, vector<128x128xbf16>, vector<256x128xf32> -> vector<256x128xf32>
    %c0_13 = arith.constant 0 : index
    %c0_14 = arith.constant 0 : index
    %20 = vector.load %arg6[%c0_13, %c0_14] : memref<1x128xf32, #tpu.memory_space<vmem>>, vector<1x128xf32>
    %21 = vector.broadcast %20 : vector<1x128xf32> to vector<256x128xf32>
    %22 = arith.addf %19, %21 : vector<256x128xf32>
    %c0_15 = arith.constant 0 : index
    %c0_16 = arith.constant 0 : index
    %23 = vector.load %arg7[%c0_15, %c0_16] : memref<256x128xf32, #tpu.memory_space<vmem>>, vector<256x128xf32>
    tpu.vector_store %arg7[%c0_15, %c0_16], %22 {strides = array<i32>} : memref<256x128xf32, #tpu.memory_space<vmem>>, vector<256x128xf32>,
    return
  }
  func.func @transform_0(%arg0: i32) -> (i32, i32) {
    %c0_i32 = arith.constant 0 : i32
    %c0_i32_0 = arith.constant 0 : i32
    return %arg0, %c0_i32 : i32, i32
  }
  func.func @transform_1(%arg0: i32) -> (i32, i32) {
    %c0_i32 = arith.constant 0 : i32
    %c0_i32_0 = arith.constant 0 : i32
    return %arg0, %c0_i32 : i32, i32
  }
  func.func @transform_2(%arg0: i32) -> (i32, i32) {
    %c0_i32 = arith.constant 0 : i32
    %c0_i32_0 = arith.constant 0 : i32
    %c0_i32_1 = arith.constant 0 : i32
    return %c0_i32, %c0_i32_0 : i32, i32
  }
  func.func @transform_3(%arg0: i32) -> (i32, i32) {
    %c0_i32 = arith.constant 0 : i32
    %c0_i32_0 = arith.constant 0 : i32
    %c0_i32_1 = arith.constant 0 : i32
    return %c0_i32, %c0_i32_0 : i32, i32
  }
  func.func @transform_4(%arg0: i32) -> (i32, i32) {
    %c0_i32 = arith.constant 0 : i32
    %c0_i32_0 = arith.constant 0 : i32
    %c0_i32_1 = arith.constant 0 : i32
    return %c0_i32, %c0_i32_0 : i32, i32
  }
  func.func @transform_5(%arg0: i32) -> (i32, i32) {
    %c0_i32 = arith.constant 0 : i32
    %c0_i32_0 = arith.constant 0 : i32
    %c0_i32_1 = arith.constant 0 : i32
    return %c0_i32, %c0_i32_0 : i32, i32
  }
  func.func @transform_6(%arg0: i32) -> (i32, i32) {
    %c0_i32 = arith.constant 0 : i32
    %c0_i32_0 = arith.constant 0 : i32
    return %arg0, %c0_i32 : i32, i32
  }
}

</mosaic_0001>

<bundles_post_ra>
// kernel: pgd_adversary_forward.1
= control target key start
LH: loop header
LB: loop body
LE: loop exit
PB: predicated region body
PF: predicated region fallthrough
CT: control target
= control target key end

     0   :  { %vm287_vm0 = vcmask 261120   ;;  %s1498_s2 = inlined_call_operand.vmem [shape: bf16[32,128], index: 2, kind: input, shape index: {}]   ;;  %s1499_s0 = inlined_call_operand.vmem [shape: bf16[256,32], index: 0, kind: input, shape index: {}]   ;;  %s1500_s1 = inlined_call_operand.vmem [shape: bf16[256,32], index: 1, kind: input, shape index: {}]   ;;  %s1501_s4 = inlined_call_operand.vmem [shape: bf16[128,128], index: 4, kind: input, shape index: {}]   ;;  %s1502_s3 = inlined_call_operand.vmem [shape: f32[1,128], index: 3, kind: input, shape index: {}]   ;;  %s1503_s5 = inlined_call_operand.vmem [shape: f32[1,128], index: 5, kind: input, shape index: {}]   ;;  %s1504_s6 = inlined_call_operand.vmem [shape: f32[256,128], index: 6, kind: output, shape index: {}]  }
   0x1   :  { %v1141_v0 = vld [vmem:[%s1498_s2] sm:$0xff]   ;;  %v1142_v1 = vld [vmem:[%s1498_s2 + $0x8] sm:$0xff]   ;;  %v970_v10 = vld [vmem:[%s1499_s0 + $0x10] sm:$0xff]  }
   0x2   :  { %1041 = vmatprep.subr.bf16.mxu0 %v1141_v0  ;;  %v842_v2 = vld [vmem:[%s1499_s0] sm:$0xff]   ;;  %v969_v4 = vld [vmem:[%s1499_s0 + $0x8] sm:$0xff]   ;;  %v985_v11 = vld [vmem:[%s1500_s1 + $0x10] sm:$0xff]   ;;  %v851_v19 = vunpack.c.l.bf16 %v970_v10  ;;  %v852_v20 = vunpack.c.h.bf16 %v970_v10 }
   0x3   :  { %v906_v3 = vld [vmem:[%s1500_s1] sm:$0xff]   ;;  %1042 = vmatpush3.bf16.msra.mxu0 %v1141_v0  ;;  %v843_v5 = vunpack.c.l.bf16 %v842_v2  ;;  %v844_v6 = vunpack.c.h.bf16 %v842_v2  ;;  %v984_v9 = vld [vmem:[%s1500_s1 + $0x8] sm:$0xff]   ;;  %v847_v12 = vunpack.c.l.bf16 %v969_v4  ;;  %v848_v13 = vunpack.c.h.bf16 %v969_v4  ;;  %v971_v16 = vld [vmem:[%s1499_s0 + $0x18] sm:$0xff]  }
   0x4   :  { %v907_v7 = vunpack.c.l.bf16 %v906_v3  ;;  %v908_v8 = vunpack.c.h.bf16 %v906_v3  ;;  %1043 = vmatprep.subr.bf16.mxu0 %v1142_v1  ;;  %v911_v14 = vunpack.c.l.bf16 %v984_v9  ;;  %v912_v15 = vunpack.c.h.bf16 %v984_v9  ;;  %v986_v25 = vld [vmem:[%s1500_s1 + $0x18] sm:$0xff]   ;;  %v972_v34 = vld [vmem:[%s1499_s0 + $0x20] sm:$0xff]   ;;  %v973_v48 = vld [vmem:[%s1499_s0 + $0x28] sm:$0xff]  }
   0x5   :  { %v915_v23 = vunpack.c.l.bf16 %v985_v11  ;;  %v916_v24 = vunpack.c.h.bf16 %v985_v11  ;;  %v855_v28 = vunpack.c.l.bf16 %v971_v16  ;;  %v856_v29 = vunpack.c.h.bf16 %v971_v16  ;;  %v987_v43 = vld [vmem:[%s1500_s1 + $0x20] sm:$0xff]   ;;  %v988_v49 = vld [vmem:[%s1500_s1 + $0x28] sm:$0xff]   ;;  %v974_v54 = vld [vmem:[%s1499_s0 + $0x30] sm:$0xff]  }
   0x6   :  { %v152_v17 = vadd.f32 %v907_v7, %v843_v5  ;;  %v153_v18 = vadd.f32 %v908_v8, %v844_v6  ;;  %v154_v21 = vadd.f32 %v911_v14, %v847_v12  ;;  %v155_v22 = vadd.f32 %v912_v15, %v848_v13  ;;  %v989_v55 = vld [vmem:[%s1500_s1 + $0x30] sm:$0xff]   ;;  %v1143_v0 = vld [vmem:[%s1501_s4] sm:$0xff]   ;;  %v975_v5 = vld [vmem:[%s1499_s0 + $0x38] sm:$0xff]  }
   0x7   :  { %1044 = vmatpush3.bf16.msra.mxu0 %v1142_v1  ;;  %v156_v32 = vadd.f32 %v915_v23, %v851_v19  ;;  %v157_v33 = vadd.f32 %v916_v24, %v852_v20  ;;  %v919_v37 = vunpack.c.l.bf16 %v986_v25  ;;  %v920_v38 = vunpack.c.h.bf16 %v986_v25  ;;  %v1144_v6 = vld [vmem:[%s1501_s4 + $0x8] sm:$0xff]   ;;  %v990_v15 = vld [vmem:[%s1500_s1 + $0x38] sm:$0xff]   ;;  %v976_v16 = vld [vmem:[%s1499_s0 + $0x40] sm:$0xff]   ;;  %1125 = vmatprep.subr.bf16.mxu1 %v1143_v0 }
   0x8   :  { %v184_v26 = vmax.f32 %v152_v17, 0.0  ;;  %v185_v27 = vmax.f32 %v153_v18, 0.0  ;;  %v186_v30 = vmax.f32 %v154_v21, 0.0  ;;  %v187_v31 = vmax.f32 %v155_v22, 0.0  ;;  %1077 = vmatprep.subr.bf16.mxu0 %v1143_v0  ;;  %v991_v21 = vld [vmem:[%s1500_s1 + $0x40] sm:$0xff]   ;;  %v1145_v22 = vld [vmem:[%s1501_s4 + $0x10] sm:$0xff]   ;;  %1133 = vmatpush3.bf16.msra.mxu1 %v1143_v0 }
   0x9   :  { %v188_v41 = vmax.f32 %v156_v32, 0.0  ;;  %v189_v42 = vmax.f32 %v157_v33, 0.0  ;;  %v158_v45 = vadd.f32 %v919_v37, %v855_v28  ;;  %v159_v46 = vadd.f32 %v920_v38, %v856_v29  ;;  %1126 = vmatprep.subr.bf16.mxu1 %v1144_v6 }
   0xa   :  { %v216_v35 = vmin.f32 %v184_v26, 1.0  ;;  %v217_v36 = vmin.f32 %v185_v27, 1.0  ;;  %v218_v39 = vmin.f32 %v186_v30, 1.0  ;;  %v219_v40 = vmin.f32 %v187_v31, 1.0 }
   0xb   :  { %v859_v47 = vunpack.c.l.bf16 %v972_v34  ;;  %v220_v51 = vmin.f32 %v188_v41, 1.0  ;;  %v221_v52 = vmin.f32 %v189_v42, 1.0  ;;  %v860_v53 = vunpack.c.h.bf16 %v972_v34 }
   0xc   :  { %v248_v44 = vpack.c.bf16 %v217_v36, %v216_v35  ;;  %v249_v50 = vpack.c.bf16 %v219_v40, %v218_v39  ;;  %v190_v56 = vmax.f32 %v158_v45, 0.0  ;;  %v191_v57 = vmax.f32 %v159_v46, 0.0  ;;  %v977_v35 = vld [vmem:[%s1499_s0 + $0x48] sm:$0xff]   ;;  %v1146_v40 = vld [vmem:[%s1501_s4 + $0x18] sm:$0xff]   ;;  %1134 = vmatpush3.bf16.msra.mxu1 %v1144_v6 }
   0xd   :  { %v923_v58 = vunpack.c.l.bf16 %v987_v43  ;;  %v924_v59 = vunpack.c.h.bf16 %v987_v43  ;;  %v250_v60 = vpack.c.bf16 %v221_v52, %v220_v51  ;;  %v863_v61 = vunpack.c.l.bf16 %v973_v48  ;;  %v992_v45 = vld [vmem:[%s1500_s1 + $0x48] sm:$0xff]   ;;  %1127 = vmatprep.subr.bf16.mxu1 %v1145_v22 }
   0xe   :  { %1045 = vmatprep.mubr.msk.bf16.mxu0 %vm287_vm0, %v248_v44  ;;  %v864_v62 = vunpack.c.h.bf16 %v973_v48  ;;  %v927_v63 = vunpack.c.l.bf16 %v988_v49  ;;  %v222_v1 = vmin.f32 %v190_v56, 1.0  ;;  %v223_v2 = vmin.f32 %v191_v57, 1.0 }
   0xf   :  { %1046 = vmatmul.mubr.msk.bf16.vlgmr.msra.gmra.mrb[0].mxu0 %vm287_vm0, %v249_v50  ;;  %v160_v3 = vadd.f32 %v923_v58, %v859_v47  ;;  %v161_v4 = vadd.f32 %v924_v59, %v860_v53  ;;  %v928_v7 = vunpack.c.h.bf16 %v988_v49  ;;  %v867_v9 = vunpack.c.l.bf16 %v974_v54  ;;  %v978_v49 = vld [vmem:[%s1499_s0 + $0x50] sm:$0xff]   ;;  %v1147_v58 = vld [vmem:[%s1501_s4 + $0x20] sm:$0xff]  }
  0x10   :  { %1049 = vmatprep.mubr.msk.bf16.mxu0 %vm287_vm0, %v250_v60  ;;  %v162_v8 = vadd.f32 %v927_v63, %v863_v61  ;;  %v868_v10 = vunpack.c.h.bf16 %v974_v54  ;;  %v251_v11 = vpack.c.bf16 %v223_v2, %v222_v1  ;;  %v931_v14 = vunpack.c.l.bf16 %v989_v55  ;;  %1078 = vmatpush3.bf16.msra.mxu0 %v1143_v0  ;;  %v993_v54 = vld [vmem:[%s1500_s1 + $0x50] sm:$0xff]  }
  0x11   :  { %v192_v12 = vmax.f32 %v160_v3, 0.0  ;;  %v193_v13 = vmax.f32 %v161_v4, 0.0  ;;  %v163_v17 = vadd.f32 %v928_v7, %v864_v62  ;;  %v932_v19 = vunpack.c.h.bf16 %v989_v55  ;;  %1079 = vmatprep.subr.bf16.mxu0 %v1144_v6  ;;  %1135 = vmatpush3.bf16.msra.mxu1 %v1145_v22  ;;  %v994_v7 = vld [vmem:[%s1500_s1 + $0x58] sm:$0xff]  }
  0x12   :  { %v194_v18 = vmax.f32 %v162_v8, 0.0  ;;  %v871_v20 = vunpack.c.l.bf16 %v975_v5  ;;  %v164_v25 = vadd.f32 %v931_v14, %v867_v9  ;;  %v872_v26 = vunpack.c.h.bf16 %v975_v5  ;;  %1128 = vmatprep.subr.bf16.mxu1 %v1146_v40  ;;  %v1148_v9 = vld [vmem:[%s1501_s4 + $0x28] sm:$0xff]   ;;  %v995_v14 = vld [vmem:[%s1500_s1 + $0x60] sm:$0xff]  }
  0x13   :  { %v224_v23 = vmin.f32 %v192_v12, 1.0  ;;  %v225_v24 = vmin.f32 %v193_v13, 1.0  ;;  %v195_v27 = vmax.f32 %v163_v17, 0.0  ;;  %v165_v29 = vadd.f32 %v932_v19, %v868_v10  ;;  %v980_v13 = vld [vmem:[%s1499_s0 + $0x60] sm:$0xff]  }
  0x14   :  { %v226_v28 = vmin.f32 %v194_v18, 1.0  ;;  %v935_v30 = vunpack.c.l.bf16 %v990_v15  ;;  %v196_v32 = vmax.f32 %v164_v25, 0.0  ;;  %v936_v33 = vunpack.c.h.bf16 %v990_v15  ;;  %1080 = vmatpush3.bf16.msra.mxu0 %v1144_v6  ;;  %v979_v6 = vld [vmem:[%s1499_s0 + $0x58] sm:$0xff]  }
  0x15   :  { %v252_v31 = vpack.c.bf16 %v225_v24, %v224_v23  ;;  %v875_v34 = vunpack.c.l.bf16 %v976_v16  ;;  %v227_v36 = vmin.f32 %v195_v27, 1.0  ;;  %v197_v37 = vmax.f32 %v165_v29, 0.0  ;;  %1081 = vmatprep.subr.bf16.mxu0 %v1145_v22  ;;  %1136 = vmatpush3.bf16.msra.mxu1 %v1146_v40 }
  0x16   :  { %v166_v38 = vadd.f32 %v935_v30, %v871_v20  ;;  %v876_v39 = vunpack.c.h.bf16 %v976_v16  ;;  %v228_v41 = vmin.f32 %v196_v32, 1.0  ;;  %v167_v42 = vadd.f32 %v936_v33, %v872_v26  ;;  %1129 = vmatprep.subr.bf16.mxu1 %v1147_v58  ;;  %v981_v32 = vld [vmem:[%s1499_s0 + $0x68] sm:$0xff]  }
  0x17   :  { %1050 = vmatmul.mubr.msk.bf16.gmra.mrb[4].mxu0 %vm287_vm0, %v251_v11  ;;  %v939_v43 = vunpack.c.l.bf16 %v991_v21  ;;  %v940_v44 = vunpack.c.h.bf16 %v991_v21  ;;  %v229_v46 = vmin.f32 %v197_v37, 1.0  ;;  %v879_v48 = vunpack.c.l.bf16 %v977_v35  ;;  %v996_v37 = vld [vmem:[%s1500_s1 + $0x68] sm:$0xff]  }
  0x18   :  { %1053 = vmatprep.mubr.msk.bf16.mxu0 %vm287_vm0, %v252_v31  ;;  %v198_v47 = vmax.f32 %v166_v38, 0.0  ;;  %v199_v50 = vmax.f32 %v167_v42, 0.0  ;;  %v880_v53 = vunpack.c.h.bf16 %v977_v35  ;;  %1082 = vmatpush3.bf16.msra.mxu0 %v1145_v22  ;;  %v253_v55 = vpack.c.bf16 %v227_v36, %v226_v28  ;;  %v997_v42 = vld [vmem:[%s1500_s1 + $0x70] sm:$0xff]  }
  0x19   :  { %v168_v51 = vadd.f32 %v939_v43, %v875_v34  ;;  %v169_v52 = vadd.f32 %v940_v44, %v876_v39  ;;  %v943_v56 = vunpack.c.l.bf16 %v992_v45  ;;  %v944_v57 = vunpack.c.h.bf16 %v992_v45  ;;  %1083 = vmatprep.subr.bf16.mxu0 %v1146_v40  ;;  %1137 = vmatpush3.bf16.msra.mxu1 %v1147_v58  ;;  %v982_v39 = vld [vmem:[%s1499_s0 + $0x70] sm:$0xff]  }
  0x1a   :  { %v254_v59 = vpack.c.bf16 %v229_v46, %v228_v41  ;;  %v883_v62 = vunpack.c.l.bf16 %v978_v49  ;;  %v230_v63 = vmin.f32 %v198_v47, 1.0  ;;  %v231_v0 = vmin.f32 %v199_v50, 1.0  ;;  %1130 = vmatprep.subr.bf16.mxu1 %v1148_v9 }
  0x1b   :  { %v200_v60 = vmax.f32 %v168_v51, 0.0  ;;  %v201_v61 = vmax.f32 %v169_v52, 0.0  ;;  %v884_v1 = vunpack.c.h.bf16 %v978_v49  ;;  %v947_v2 = vunpack.c.l.bf16 %v993_v54 }
  0x1c   :  { %v170_v3 = vadd.f32 %v943_v56, %v879_v48  ;;  %v171_v4 = vadd.f32 %v944_v57, %v880_v53  ;;  %v948_v5 = vunpack.c.h.bf16 %v993_v54  ;;  %1084 = vmatpush3.bf16.msra.mxu0 %v1146_v40  ;;  %v255_v15 = vpack.c.bf16 %v231_v0, %v230_v63  ;;  %v983_v63 = vld [vmem:[%s1499_s0 + $0x78] sm:$0xff]  }
  0x1d   :  { %v172_v8 = vadd.f32 %v947_v2, %v883_v62  ;;  %1085 = vmatprep.subr.bf16.mxu0 %v1147_v58  ;;  %v232_v10 = vmin.f32 %v200_v60, 1.0  ;;  %v233_v11 = vmin.f32 %v201_v61, 1.0  ;;  %v887_v16 = vunpack.c.l.bf16 %v979_v6  ;;  %1138 = vmatpush3.bf16.msra.mxu1 %v1148_v9  ;;  %v998_v0 = vld [vmem:[%s1500_s1 + $0x78] sm:$0xff]  }
  0x1e   :  { %v173_v12 = vadd.f32 %v948_v5, %v884_v1  ;;  %v951_v17 = vunpack.c.l.bf16 %v994_v7  ;;  %v202_v18 = vmax.f32 %v170_v3, 0.0  ;;  %v203_v19 = vmax.f32 %v171_v4, 0.0 }
  0x1f   :  { %1054 = vmatmul.mubr.msk.bf16.gmra.mrb[8].mxu0 %vm287_vm0, %v253_v55  ;;  %v888_v20 = vunpack.c.h.bf16 %v979_v6  ;;  %v952_v21 = vunpack.c.h.bf16 %v994_v7  ;;  %v204_v22 = vmax.f32 %v172_v8, 0.0  ;;  %v891_v24 = vunpack.c.l.bf16 %v980_v13 }
  0x20   :  { %1057 = vmatprep.mubr.msk.bf16.mxu0 %vm287_vm0, %v254_v59  ;;  %1086 = vmatpush3.bf16.msra.mxu0 %v1147_v58  ;;  %v205_v23 = vmax.f32 %v173_v12, 0.0  ;;  %v955_v25 = vunpack.c.l.bf16 %v995_v14  ;;  %v256_v26 = vpack.c.bf16 %v233_v11, %v232_v10  ;;  %v892_v27 = vunpack.c.h.bf16 %v980_v13 }
  0x21   :  { %1087 = vmatprep.subr.bf16.mxu0 %v1148_v9  ;;  %v956_v28 = vunpack.c.h.bf16 %v995_v14  ;;  %v174_v29 = vadd.f32 %v951_v17, %v887_v16  ;;  %v234_v30 = vmin.f32 %v202_v18, 1.0  ;;  %v175_v31 = vadd.f32 %v952_v21, %v888_v20 }
  0x22   :  { %v235_v33 = vmin.f32 %v203_v19, 1.0  ;;  %v236_v34 = vmin.f32 %v204_v22, 1.0  ;;  %v237_v35 = vmin.f32 %v205_v23, 1.0  ;;  %v176_v36 = vadd.f32 %v955_v25, %v891_v24  ;;  %v1149_v24 = vld [vmem:[%s1501_s4 + $0x30] sm:$0xff]   ;;  %v1150_v25 = vld [vmem:[%s1501_s4 + $0x38] sm:$0xff]  }
  0x23   :  { %v177_v38 = vadd.f32 %v956_v28, %v892_v27  ;;  %v206_v40 = vmax.f32 %v174_v29, 0.0  ;;  %v895_v41 = vunpack.c.l.bf16 %v981_v32  ;;  %v207_v43 = vmax.f32 %v175_v31, 0.0  ;;  %1131 = vmatprep.subr.bf16.mxu1 %v1149_v24 }
  0x24   :  { %1088 = vmatpush3.bf16.msra.mxu0 %v1148_v9  ;;  %v896_v44 = vunpack.c.h.bf16 %v981_v32  ;;  %v959_v45 = vunpack.c.l.bf16 %v996_v37  ;;  %v960_v46 = vunpack.c.h.bf16 %v996_v37  ;;  %v257_v47 = vpack.c.bf16 %v235_v33, %v234_v30  ;;  %1139 = vmatpush3.bf16.msra.mxu1 %v1149_v24 }
  0x25   :  { %v258_v48 = vpack.c.bf16 %v237_v35, %v236_v34  ;;  %v208_v49 = vmax.f32 %v176_v36, 0.0  ;;  %v899_v50 = vunpack.c.l.bf16 %v982_v39  ;;  %v209_v51 = vmax.f32 %v177_v38, 0.0  ;;  %1089 = vmatprep.subr.bf16.mxu0 %v1149_v24  ;;  %1132 = vmatprep.subr.bf16.mxu1 %v1150_v25 }
  0x26   :  { %v900_v52 = vunpack.c.h.bf16 %v982_v39  ;;  %v963_v53 = vunpack.c.l.bf16 %v997_v42  ;;  %v964_v54 = vunpack.c.h.bf16 %v997_v42  ;;  %v238_v55 = vmin.f32 %v206_v40, 1.0 }
  0x27   :  { %1058 = vmatmul.mubr.msk.bf16.gmra.mrb[12].mxu0 %vm287_vm0, %v255_v15  ;;  %v239_v56 = vmin.f32 %v207_v43, 1.0  ;;  %v178_v57 = vadd.f32 %v959_v45, %v895_v41  ;;  %v179_v58 = vadd.f32 %v960_v46, %v896_v44  ;;  %v240_v59 = vmin.f32 %v208_v49, 1.0 }
  0x28   :  { %1061 = vmatprep.mubr.msk.bf16.mxu0 %vm287_vm0, %v256_v26  ;;  %v241_v60 = vmin.f32 %v209_v51, 1.0  ;;  %v180_v61 = vadd.f32 %v963_v53, %v899_v50  ;;  %v181_v62 = vadd.f32 %v964_v54, %v900_v52  ;;  %v903_v4 = vunpack.c.l.bf16 %v983_v63  ;;  %1090 = vmatpush3.bf16.msra.mxu0 %v1149_v24  ;;  %v1331_v26 = vld [vmem:[%s1502_s3] ss:$0 sm:$0xff] }
  0x29   :  { %v259_v1 = vpack.c.bf16 %v239_v56, %v238_v55  ;;  %v210_v2 = vmax.f32 %v178_v57, 0.0  ;;  %v211_v3 = vmax.f32 %v179_v58, 0.0  ;;  %v904_v5 = vunpack.c.h.bf16 %v983_v63  ;;  %1091 = vmatprep.subr.bf16.mxu0 %v1150_v25  ;;  %1140 = vmatpush3.bf16.msra.mxu1 %v1150_v25 }
  0x2a   :  { %v967_v6 = vunpack.c.l.bf16 %v998_v0  ;;  %v968_v7 = vunpack.c.h.bf16 %v998_v0  ;;  %v260_v8 = vpack.c.bf16 %v241_v60, %v240_v59  ;;  %v212_v9 = vmax.f32 %v180_v61, 0.0 }
  0x2b   :  { %v213_v10 = vmax.f32 %v181_v62, 0.0  ;;  %v242_v11 = vmin.f32 %v210_v2, 1.0  ;;  %v243_v12 = vmin.f32 %v211_v3, 1.0 }
  0x2c   :  { %v182_v13 = vadd.f32 %v967_v6, %v903_v4  ;;  %v183_v14 = vadd.f32 %v968_v7, %v904_v5  ;;  %v244_v15 = vmin.f32 %v212_v9, 1.0  ;;  %1092 = vmatpush3.bf16.msra.mxu0 %v1150_v25 }
  0x2d   :  { %v245_v16 = vmin.f32 %v213_v10, 1.0  ;;  %v261_v17 = vpack.c.bf16 %v243_v12, %v242_v11 }
  0x2e   :  { %v214_v18 = vmax.f32 %v182_v13, 0.0  ;;  %v215_v19 = vmax.f32 %v183_v14, 0.0 }
  0x2f   :  { %1062 = vmatmul.mubr.msk.bf16.gmra.mrb[16].mxu0 %vm287_vm0, %v257_v47  ;;  %v262_v20 = vpack.c.bf16 %v245_v16, %v244_v15 }
  0x30   :  { %1065 = vmatprep.mubr.msk.bf16.mxu0 %vm287_vm0, %v258_v48  ;;  %v246_v21 = vmin.f32 %v214_v18, 1.0  ;;  %v247_v22 = vmin.f32 %v215_v19, 1.0 }
  0x32   :  { %v263_v23 = vpack.c.bf16 %v247_v22, %v246_v21 }
  0x37   :  { %1066 = vmatmul.mubr.msk.bf16.gmra.mrb[20].mxu0 %vm287_vm0, %v259_v1 }
  0x38   :  { %1069 = vmatprep.mubr.msk.bf16.mxu0 %vm287_vm0, %v260_v8 }
  0x3f   :  { %1070 = vmatmul.mubr.msk.bf16.gmra.mrb[24].mxu0 %vm287_vm0, %v261_v17 }
  0x40   :  { %1073 = vmatprep.mubr.msk.bf16.mxu0 %vm287_vm0, %v262_v20 }
  0x47   :  { %1074 = vmatmul.mubr.msk.bf16.gmra.mrb[28].mxu0 %vm287_vm0, %v263_v23 }
  0xe2   :  { %v1047_v27 = vpop.f32.mrb[0].mxu0 }
  0xe3   :  { %v379_v28 = vadd.f32 %v1047_v27, %v1331_v26  ;;  %v370_v29 = vpop.f32.mrb[1].mxu0 }
  0xe4   :  { %v371_v30 = vadd.f32 %v1331_v26, %v370_v29  ;;  %v1048_v31 = vpop.f32.mrb[2].mxu0 }
  0xe5   :  { %v382_v32 = vadd.f32 %v1048_v31, %v1331_v26  ;;  %v373_v33 = vpop.f32.mrb[3].mxu0  ;;  %v499_v35 = vmax.f32 %v379_v28, 0.0 }
  0xe6   :  { %v374_v34 = vadd.f32 %v1331_v26, %v373_v33  ;;  %v497_v37 = vmax.f32 %v371_v30, 0.0 }
  0xe7   :  { %v500_v36 = vmax.f32 %v382_v32, 0.0 }
  0xe8   :  { %v498_v38 = vmax.f32 %v374_v34, 0.0 }
  0xe9   :  { %v530_v39 = vpack.c.bf16 %v500_v36, %v499_v35 }
  0xea   :  { %v529_v40 = vpack.c.bf16 %v498_v38, %v497_v37  ;;  %v1051_v41 = vpop.f32.mrb[4].mxu0 }
  0xeb   :  { %v395_v42 = vadd.f32 %v1051_v41, %v1331_v26  ;;  %v386_v43 = vpop.f32.mrb[5].mxu0 }
  0xec   :  { %v387_v44 = vadd.f32 %v1331_v26, %v386_v43  ;;  %v1052_v45 = vpop.f32.mrb[6].mxu0  ;;  %1093 = vmatprep.mubr.bf16.mxu0 %v529_v40 }
  0xed   :  { %v398_v46 = vadd.f32 %v1052_v45, %v1331_v26  ;;  %v389_v47 = vpop.f32.mrb[7].mxu0  ;;  %1094 = vmatmul.mubr.bf16.vlgmr.msra.gmra.mrb[32].mxu0 %v530_v39  ;;  %v503_v49 = vmax.f32 %v395_v42, 0.0 }
  0xee   :  { %v390_v48 = vadd.f32 %v1331_v26, %v389_v47  ;;  %v501_v51 = vmax.f32 %v387_v44, 0.0 }
  0xef   :  { %v504_v50 = vmax.f32 %v398_v46, 0.0 }
  0xf0   :  { %v502_v52 = vmax.f32 %v390_v48, 0.0 }
  0xf1   :  { %v532_v53 = vpack.c.bf16 %v504_v50, %v503_v49 }
  0xf2   :  { %v1055_v54 = vpop.f32.mrb[8].mxu0  ;;  %v531_v55 = vpack.c.bf16 %v502_v52, %v501_v51 }
  0xf3   :  { %v411_v56 = vadd.f32 %v1055_v54, %v1331_v26  ;;  %v402_v57 = vpop.f32.mrb[9].mxu0 }
  0xf4   :  { %v403_v58 = vadd.f32 %v1331_v26, %v402_v57  ;;  %v1056_v59 = vpop.f32.mrb[10].mxu0  ;;  %1097 = vmatprep.mubr.bf16.mxu1 %v531_v55 }
  0xf5   :  { %v414_v60 = vadd.f32 %v1056_v59, %v1331_v26  ;;  %v405_v61 = vpop.f32.mrb[11].mxu0  ;;  %1098 = vmatmul.mubr.bf16.vlgmr.msra.gmra.mrb[0].mxu1 %v532_v53  ;;  %v507_v63 = vmax.f32 %v411_v56, 0.0 }
  0xf6   :  { %v406_v62 = vadd.f32 %v1331_v26, %v405_v61  ;;  %v505_v1 = vmax.f32 %v403_v58, 0.0 }
  0xf7   :  { %v508_v0 = vmax.f32 %v414_v60, 0.0 }
  0xf8   :  { %v506_v2 = vmax.f32 %v406_v62, 0.0 }
  0xf9   :  { %v534_v3 = vpack.c.bf16 %v508_v0, %v507_v63 }
  0xfa   :  { %v533_v4 = vpack.c.bf16 %v506_v2, %v505_v1  ;;  %v1059_v5 = vpop.f32.mrb[12].mxu0 }
  0xfb   :  { %v427_v6 = vadd.f32 %v1059_v5, %v1331_v26  ;;  %v418_v7 = vpop.f32.mrb[13].mxu0 }
  0xfc   :  { %v419_v8 = vadd.f32 %v1331_v26, %v418_v7  ;;  %v1060_v9 = vpop.f32.mrb[14].mxu0  ;;  %1101 = vmatprep.mubr.bf16.mxu1 %v533_v4 }
  0xfd   :  { %v430_v10 = vadd.f32 %v1060_v9, %v1331_v26  ;;  %v421_v11 = vpop.f32.mrb[15].mxu0  ;;  %1102 = vmatmul.mubr.bf16.gmra.mrb[4].mxu1 %v534_v3  ;;  %v511_v13 = vmax.f32 %v427_v6, 0.0 }
  0xfe   :  { %v422_v12 = vadd.f32 %v1331_v26, %v421_v11  ;;  %v509_v15 = vmax.f32 %v419_v8, 0.0 }
  0xff   :  { %v512_v14 = vmax.f32 %v430_v10, 0.0 }
 0x100   :  { %v510_v16 = vmax.f32 %v422_v12, 0.0  ;;  %v1368_v12 = vld [vmem:[%s1503_s5] ss:$0 sm:$0xff] }
 0x101   :  { %v536_v17 = vpack.c.bf16 %v512_v14, %v511_v13 }
 0x102   :  { %v535_v18 = vpack.c.bf16 %v510_v16, %v509_v15  ;;  %v1063_v19 = vpop.f32.mrb[16].mxu0 }
 0x103   :  { %v443_v20 = vadd.f32 %v1063_v19, %v1331_v26  ;;  %v434_v21 = vpop.f32.mrb[17].mxu0 }
 0x104   :  { %v435_v22 = vadd.f32 %v1331_v26, %v434_v21  ;;  %v1064_v23 = vpop.f32.mrb[18].mxu0  ;;  %1105 = vmatprep.mubr.bf16.mxu1 %v535_v18 }
 0x105   :  { %v446_v24 = vadd.f32 %v1064_v23, %v1331_v26  ;;  %v437_v25 = vpop.f32.mrb[19].mxu0  ;;  %1106 = vmatmul.mubr.bf16.gmra.mrb[8].mxu1 %v536_v17  ;;  %v515_v28 = vmax.f32 %v443_v20, 0.0 }
 0x106   :  { %v438_v27 = vadd.f32 %v1331_v26, %v437_v25  ;;  %v513_v30 = vmax.f32 %v435_v22, 0.0 }
 0x107   :  { %v516_v29 = vmax.f32 %v446_v24, 0.0 }
 0x108   :  { %v514_v31 = vmax.f32 %v438_v27, 0.0 }
 0x109   :  { %v538_v32 = vpack.c.bf16 %v516_v29, %v515_v28 }
 0x10a   :  { %v537_v33 = vpack.c.bf16 %v514_v31, %v513_v30  ;;  %v1067_v34 = vpop.f32.mrb[20].mxu0 }
 0x10b   :  { %v459_v35 = vadd.f32 %v1067_v34, %v1331_v26  ;;  %v450_v36 = vpop.f32.mrb[21].mxu0 }
 0x10c   :  { %v451_v37 = vadd.f32 %v1331_v26, %v450_v36  ;;  %v1068_v38 = vpop.f32.mrb[22].mxu0  ;;  %1109 = vmatprep.mubr.bf16.mxu1 %v537_v33 }
 0x10d   :  { %v462_v39 = vadd.f32 %v1068_v38, %v1331_v26  ;;  %v453_v40 = vpop.f32.mrb[23].mxu0  ;;  %1110 = vmatmul.mubr.bf16.gmra.mrb[12].mxu1 %v538_v32  ;;  %v519_v42 = vmax.f32 %v459_v35, 0.0 }
 0x10e   :  { %v454_v41 = vadd.f32 %v1331_v26, %v453_v40  ;;  %v517_v44 = vmax.f32 %v451_v37, 0.0 }
 0x10f   :  { %v520_v43 = vmax.f32 %v462_v39, 0.0 }
 0x110   :  { %v518_v45 = vmax.f32 %v454_v41, 0.0 }
 0x111   :  { %v540_v46 = vpack.c.bf16 %v520_v43, %v519_v42 }
 0x112   :  { %v539_v47 = vpack.c.bf16 %v518_v45, %v517_v44  ;;  %v1071_v48 = vpop.f32.mrb[24].mxu0 }
 0x113   :  { %v475_v49 = vadd.f32 %v1071_v48, %v1331_v26  ;;  %v466_v50 = vpop.f32.mrb[25].mxu0 }
 0x114   :  { %v467_v51 = vadd.f32 %v1331_v26, %v466_v50  ;;  %v1072_v52 = vpop.f32.mrb[26].mxu0  ;;  %1113 = vmatprep.mubr.bf16.mxu1 %v539_v47 }
 0x115   :  { %v478_v53 = vadd.f32 %v1072_v52, %v1331_v26  ;;  %v469_v54 = vpop.f32.mrb[27].mxu0  ;;  %1114 = vmatmul.mubr.bf16.gmra.mrb[16].mxu1 %v540_v46  ;;  %v523_v56 = vmax.f32 %v475_v49, 0.0 }
 0x116   :  { %v470_v55 = vadd.f32 %v1331_v26, %v469_v54  ;;  %v521_v58 = vmax.f32 %v467_v51, 0.0 }
 0x117   :  { %v524_v57 = vmax.f32 %v478_v53, 0.0 }
 0x118   :  { %v522_v59 = vmax.f32 %v470_v55, 0.0 }
 0x119   :  { %v542_v60 = vpack.c.bf16 %v524_v57, %v523_v56 }
 0x11a   :  { %v541_v61 = vpack.c.bf16 %v522_v59, %v521_v58  ;;  %v1075_v62 = vpop.f32.mrb[28].mxu0 }
 0x11b   :  { %v491_v63 = vadd.f32 %v1075_v62, %v1331_v26  ;;  %v482_v0 = vpop.f32.mrb[29].mxu0 }
 0x11c   :  { %v483_v1 = vadd.f32 %v1331_v26, %v482_v0  ;;  %v1076_v2 = vpop.f32.mrb[30].mxu0  ;;  %1117 = vmatprep.mubr.bf16.mxu1 %v541_v61 }
 0x11d   :  { %v494_v3 = vadd.f32 %v1076_v2, %v1331_v26  ;;  %v485_v4 = vpop.f32.mrb[31].mxu0  ;;  %1118 = vmatmul.mubr.bf16.gmra.mrb[20].mxu1 %v542_v60  ;;  %v527_v6 = vmax.f32 %v491_v63, 0.0 }
 0x11e   :  { %v486_v5 = vadd.f32 %v1331_v26, %v485_v4  ;;  %v525_v8 = vmax.f32 %v483_v1, 0.0 }
 0x11f   :  { %v528_v7 = vmax.f32 %v494_v3, 0.0 }
 0x120   :  { %v526_v9 = vmax.f32 %v486_v5, 0.0 }
 0x121   :  { %v544_v10 = vpack.c.bf16 %v528_v7, %v527_v6 }
 0x122   :  { %v543_v11 = vpack.c.bf16 %v526_v9, %v525_v8 }
 0x124   :  { %1121 = vmatprep.mubr.bf16.mxu1 %v543_v11 }
 0x125   :  { %1122 = vmatmul.mubr.bf16.gmra.mrb[24].mxu1 %v544_v10 }
 0x1c0   :  { %v1095_v13 = vpop.f32.mrb[32].mxu0 }
 0x1c1   :  { %v659_v14 = vadd.f32 %v1095_v13, %v1368_v12  ;;  %v650_v15 = vpop.f32.mrb[33].mxu0 }
 0x1c2   :  { %v651_v16 = vadd.f32 %v1368_v12, %v650_v15  ;;  %v1096_v26 = vpop.f32.mrb[34].mxu0 }
 0x1c3   :  { %779 = vst [vmem:[%s1504_s6 + $0x10] sm:$0xff] %v659_v14  ;;  %v662_v17 = vadd.f32 %v1096_v26, %v1368_v12  ;;  %v653_v18 = vpop.f32.mrb[35].mxu0 }
 0x1c4   :  { %777 = vst [vmem:[%s1504_s6] sm:$0xff] %v651_v16  ;;  %v654_v19 = vadd.f32 %v1368_v12, %v653_v18 }
 0x1c5   :  { %780 = vst [vmem:[%s1504_s6 + $0x18] sm:$0xff] %v662_v17 }
 0x1c6   :  { %778 = vst [vmem:[%s1504_s6 + $0x8] sm:$0xff] %v654_v19 }
 0x1c8   :  { %v1099_v20 = vpop.f32.mrb[0].mxu1 }
 0x1c9   :  { %v675_v21 = vadd.f32 %v1099_v20, %v1368_v12  ;;  %v666_v22 = vpop.f32.mrb[1].mxu1 }
 0x1ca   :  { %v667_v23 = vadd.f32 %v1368_v12, %v666_v22  ;;  %v1100_v24 = vpop.f32.mrb[2].mxu1 }
 0x1cb   :  { %783 = vst [vmem:[%s1504_s6 + $0x30] sm:$0xff] %v675_v21  ;;  %v678_v25 = vadd.f32 %v1100_v24, %v1368_v12  ;;  %v669_v27 = vpop.f32.mrb[3].mxu1 }
 0x1cc   :  { %781 = vst [vmem:[%s1504_s6 + $0x20] sm:$0xff] %v667_v23  ;;  %v670_v28 = vadd.f32 %v1368_v12, %v669_v27 }
 0x1cd   :  { %784 = vst [vmem:[%s1504_s6 + $0x38] sm:$0xff] %v678_v25 }
 0x1ce   :  { %782 = vst [vmem:[%s1504_s6 + $0x28] sm:$0xff] %v670_v28 }
 0x1d0   :  { %v1103_v29 = vpop.f32.mrb[4].mxu1 }
 0x1d1   :  { %v691_v30 = vadd.f32 %v1103_v29, %v1368_v12  ;;  %v682_v31 = vpop.f32.mrb[5].mxu1 }
 0x1d2   :  { %v683_v32 = vadd.f32 %v1368_v12, %v682_v31  ;;  %v1104_v33 = vpop.f32.mrb[6].mxu1 }
 0x1d3   :  { %787 = vst [vmem:[%s1504_s6 + $0x50] sm:$0xff] %v691_v30  ;;  %v694_v34 = vadd.f32 %v1104_v33, %v1368_v12  ;;  %v685_v35 = vpop.f32.mrb[7].mxu1 }
 0x1d4   :  { %785 = vst [vmem:[%s1504_s6 + $0x40] sm:$0xff] %v683_v32  ;;  %v686_v36 = vadd.f32 %v1368_v12, %v685_v35 }
 0x1d5   :  { %788 = vst [vmem:[%s1504_s6 + $0x58] sm:$0xff] %v694_v34 }
 0x1d6   :  { %786 = vst [vmem:[%s1504_s6 + $0x48] sm:$0xff] %v686_v36 }
 0x1d8   :  { %v1107_v37 = vpop.f32.mrb[8].mxu1 }
 0x1d9   :  { %v707_v38 = vadd.f32 %v1107_v37, %v1368_v12  ;;  %v698_v39 = vpop.f32.mrb[9].mxu1 }
 0x1da   :  { %v699_v40 = vadd.f32 %v1368_v12, %v698_v39  ;;  %v1108_v41 = vpop.f32.mrb[10].mxu1 }
 0x1db   :  { %791 = vst [vmem:[%s1504_s6 + $0x70] sm:$0xff] %v707_v38  ;;  %v710_v42 = vadd.f32 %v1108_v41, %v1368_v12  ;;  %v701_v43 = vpop.f32.mrb[11].mxu1 }
 0x1dc   :  { %789 = vst [vmem:[%s1504_s6 + $0x60] sm:$0xff] %v699_v40  ;;  %v702_v44 = vadd.f32 %v1368_v12, %v701_v43 }
 0x1dd   :  { %792 = vst [vmem:[%s1504_s6 + $0x78] sm:$0xff] %v710_v42 }
 0x1de   :  { %790 = vst [vmem:[%s1504_s6 + $0x68] sm:$0xff] %v702_v44 }
 0x1e0   :  { %v1111_v45 = vpop.f32.mrb[12].mxu1 }
 0x1e1   :  { %v723_v46 = vadd.f32 %v1111_v45, %v1368_v12  ;;  %v714_v47 = vpop.f32.mrb[13].mxu1 }
 0x1e2   :  { %v715_v48 = vadd.f32 %v1368_v12, %v714_v47  ;;  %v1112_v49 = vpop.f32.mrb[14].mxu1 }
 0x1e3   :  { %795 = vst [vmem:[%s1504_s6 + $0x90] sm:$0xff] %v723_v46  ;;  %v726_v50 = vadd.f32 %v1112_v49, %v1368_v12  ;;  %v717_v51 = vpop.f32.mrb[15].mxu1 }
 0x1e4   :  { %793 = vst [vmem:[%s1504_s6 + $0x80] sm:$0xff] %v715_v48  ;;  %v718_v52 = vadd.f32 %v1368_v12, %v717_v51 }
 0x1e5   :  { %796 = vst [vmem:[%s1504_s6 + $0x98] sm:$0xff] %v726_v50 }
 0x1e6   :  { %794 = vst [vmem:[%s1504_s6 + $0x88] sm:$0xff] %v718_v52 }
 0x1e8   :  { %v1115_v53 = vpop.f32.mrb[16].mxu1 }
 0x1e9   :  { %v739_v54 = vadd.f32 %v1115_v53, %v1368_v12  ;;  %v730_v55 = vpop.f32.mrb[17].mxu1 }
 0x1ea   :  { %v731_v56 = vadd.f32 %v1368_v12, %v730_v55  ;;  %v1116_v57 = vpop.f32.mrb[18].mxu1 }
 0x1eb   :  { %799 = vst [vmem:[%s1504_s6 + $0xb0] sm:$0xff] %v739_v54  ;;  %v742_v58 = vadd.f32 %v1116_v57, %v1368_v12  ;;  %v733_v59 = vpop.f32.mrb[19].mxu1 }
 0x1ec   :  { %797 = vst [vmem:[%s1504_s6 + $0xa0] sm:$0xff] %v731_v56  ;;  %v734_v60 = vadd.f32 %v1368_v12, %v733_v59 }
 0x1ed   :  { %800 = vst [vmem:[%s1504_s6 + $0xb8] sm:$0xff] %v742_v58 }
 0x1ee   :  { %798 = vst [vmem:[%s1504_s6 + $0xa8] sm:$0xff] %v734_v60 }
 0x1f0   :  { %v1119_v61 = vpop.f32.mrb[20].mxu1 }
 0x1f1   :  { %v755_v62 = vadd.f32 %v1119_v61, %v1368_v12  ;;  %v746_v63 = vpop.f32.mrb[21].mxu1 }
 0x1f2   :  { %v747_v0 = vadd.f32 %v1368_v12, %v746_v63  ;;  %v1120_v1 = vpop.f32.mrb[22].mxu1 }
 0x1f3   :  { %803 = vst [vmem:[%s1504_s6 + $0xd0] sm:$0xff] %v755_v62  ;;  %v758_v2 = vadd.f32 %v1120_v1, %v1368_v12  ;;  %v749_v3 = vpop.f32.mrb[23].mxu1 }
 0x1f4   :  { %801 = vst [vmem:[%s1504_s6 + $0xc0] sm:$0xff] %v747_v0  ;;  %v750_v4 = vadd.f32 %v1368_v12, %v749_v3 }
 0x1f5   :  { %804 = vst [vmem:[%s1504_s6 + $0xd8] sm:$0xff] %v758_v2 }
 0x1f6   :  { %802 = vst [vmem:[%s1504_s6 + $0xc8] sm:$0xff] %v750_v4 }
 0x1f8   :  { %v1123_v5 = vpop.f32.mrb[24].mxu1 }
 0x1f9   :  { %v771_v6 = vadd.f32 %v1123_v5, %v1368_v12  ;;  %v762_v7 = vpop.f32.mrb[25].mxu1 }
 0x1fa   :  { %v763_v8 = vadd.f32 %v1368_v12, %v762_v7  ;;  %v1124_v9 = vpop.f32.mrb[26].mxu1 }
 0x1fb   :  { %807 = vst [vmem:[%s1504_s6 + $0xf0] sm:$0xff] %v771_v6  ;;  %v774_v10 = vadd.f32 %v1124_v9, %v1368_v12  ;;  %v765_v11 = vpop.f32.mrb[27].mxu1 }
 0x1fc   :  { %805 = vst [vmem:[%s1504_s6 + $0xe0] sm:$0xff] %v763_v8  ;;  %v766_v13 = vadd.f32 %v1368_v12, %v765_v11 }
 0x1fd   :  { %808 = vst [vmem:[%s1504_s6 + $0xf8] sm:$0xff] %v774_v10 }
 0x1fe   :  { %806 = vst [vmem:[%s1504_s6 + $0xe8] sm:$0xff] %v766_v13 }

</bundles_post_ra>
